<compile_context>
chip_gen: v7x
topology: tpu7x:2x2x1
jax: 0.10.0
libtpu: 0.0.40
codegen_flags: <defaults>
</compile_context>

<pallas_src>
import math
import functools

import jax
import jax.numpy as jnp
from jax.experimental import pallas as pl
from jax.experimental.pallas import tpu as pltpu


# ----------------------------- kernels -------------------------------------


def _pe_add_kernel(x_ref, pe_ref, o_ref, *, nb):
    # x_ref: (TS, nb*D), pe_ref: (TS, D)
    pe_tile = pe_ref[...].astype(jnp.float32)
    if nb > 1:
        pe_tile = jnp.tile(pe_tile, (1, nb))          # broadcast over batch in VMEM
    y = x_ref[...].astype(jnp.float32) + pe_tile
    o_ref[...] = y.astype(o_ref.dtype)


def _pe_add_dropout_kernel(x_ref, pe_ref, bits_ref, o_ref, *, nb, threshold, scale):
    pe_tile = pe_ref[...].astype(jnp.float32)
    if nb > 1:
        pe_tile = jnp.tile(pe_tile, (1, nb))
    y = x_ref[...].astype(jnp.float32) + pe_tile
    # Inverted dropout: keep with prob (1-p), scale kept values by 1/(1-p).
    # Integer compare on raw bits -- no u32->f32 convert / multiply needed.
    keep = bits_ref[...] >= jnp.uint32(threshold)
    y = jnp.where(keep, y * jnp.float32(scale), jnp.float32(0.0))
    o_ref[...] = y.astype(o_ref.dtype)


# ----------------------------- PE table ------------------------------------


def make_positional_encoding_table(d_model, max_len=100, dtype=jnp.float32):
    """pe of shape (max_len, 1, d_model); identical math to the PyTorch __init__."""
    d_pad = (d_model + 1) // 2 * 2
    position = jnp.arange(max_len, dtype=jnp.float32)[:, None]               # (max_len, 1)
    div_term = jnp.exp(jnp.arange(0, d_pad, 2, dtype=jnp.float32)
                       * (-math.log(10000.0) / d_model))                     # (d_pad//2,)
    pe = jnp.zeros((max_len, d_pad), dtype=jnp.float32)
    pe = pe.at[:, 0::2].set(jnp.sin(position * div_term))
    pe = pe.at[:, 1::2].set(jnp.cos(position * div_term))
    pe = pe[:, :d_model]                                                      # (max_len, d_model)
    return pe[:, None, :].astype(dtype)                                       # (max_len, 1, d_model)


# ----------------------------- tiling --------------------------------------


def _choose_tiles(S, B, D, itemsize, target_block_bytes=2 * 1024 * 1024):
    """Pick (row_tile, batch_cols_per_lane_chunk) for the flattened (S, B*D) slab."""
    # Lane chunk width = nb*D; nb must divide B, and if nb < B the chunk width
    # must be a multiple of 128 lanes to satisfy the block-shape constraint.
    max_nb = max(1, target_block_bytes // (8 * D * itemsize))
    nb = B
    for cand in range(min(B, max_nb), 0, -1):
        if B % cand != 0:
            continue
        if cand != B and (cand * D) % 128 != 0:
            continue
        nb = cand
        break
    tc = nb * D
    # Row tile: multiple of 8 sublanes; sized so double-buffered in/bits/out tiles
    # stay well under v7x's 32 MiB scoped-VMEM default while amortizing grid-step
    # overhead (>=512-row-equivalent blocks ~ HBM roofline per measurements).
    ts = (target_block_bytes // (tc * itemsize)) // 8 * 8
    ts = max(8, ts)
    if ts >= S:
        ts = S
    return ts, nb


# ----------------------------- wrapper --------------------------------------


def positional_encoding_forward(x, pe, *, dropout_p=0.1, training=False, rng_key=None):
    """x: (S, B, D); pe: (max_len, 1, D). Returns dropout(x + pe[:S]) like the module."""
    S, B, D = x.shape
    C = B * D
    x2 = x.reshape(S, C)                       # free reshape: contiguous, lane-dense last dim
    pe2 = pe[:S, 0, :].astype(x.dtype)         # (S, D): tiny, kept un-broadcast

    ts, nb = _choose_tiles(S, B, D, x.dtype.itemsize)
    tc = nb * D
    grid = (pl.cdiv(S, ts), C // tc)           # inner (fastest) axis = lane chunks

    x_spec = pl.BlockSpec((ts, tc), lambda i, j: (i, j))
    pe_spec = pl.BlockSpec((ts, D), lambda i, j: (i, 0))   # resident across lane chunks
    out_spec = pl.BlockSpec((ts, tc), lambda i, j: (i, j))

    cparams = pltpu.CompilerParams(
        dimension_semantics=("parallel", "parallel"),
        vmem_limit_bytes=32 * 1024 * 1024,
    )

    use_dropout = bool(training) and float(dropout_p) > 0.0

    if not use_dropout:
        kernel = functools.partial(_pe_add_kernel, nb=nb)
        out2 = pl.pallas_call(
            kernel,
            out_shape=jax.ShapeDtypeStruct((S, C), x.dtype),
            grid=grid,
            in_specs=[x_spec, pe_spec],
            out_specs=out_spec,
            compiler_params=cparams,
        )(x2, pe2)
    else:
        p = float(dropout_p)
        if p >= 1.0:
            return jnp.zeros_like(x)
        if rng_key is None:
            rng_key = jax.random.PRNGKey(0)
        bits = jax.random.bits(rng_key, (S, C), dtype=jnp.uint32)
        threshold = min(int(round(p * 2.0 ** 32)), 2 ** 32 - 1)
        scale = 1.0 / (1.0 - p)
        kernel = functools.partial(_pe_add_dropout_kernel, nb=nb,
                                   threshold=threshold, scale=scale)
        bits_spec = pl.BlockSpec((ts, tc), lambda i, j: (i, j))
        out2 = pl.pallas_call(
            kernel,
            out_shape=jax.ShapeDtypeStruct((S, C), x.dtype),
            grid=grid,
            in_specs=[x_spec, pe_spec, bits_spec],
            out_specs=out_spec,
            compiler_params=cparams,
        )(x2, pe2, bits)

    return out2.reshape(S, B, D)


# ----------------------------- demo / test ----------------------------------


if __name__ == "__main__":
    d_model = 32
    max_len = 100
    seq_len = 8
    batch = 2

    key = jax.random.PRNGKey(0)
    x = jax.random.normal(key, (seq_len, batch, d_model), dtype=jnp.float32)
    pe = make_positional_encoding_table(d_model, max_len=max_len)

    # eval-mode forward (dropout is identity in eval, matching module.eval())
    out = positional_encoding_forward(x, pe, dropout_p=0.1, training=False)
    out = jax.block_until_ready(out)

    ref = x + pe[:seq_len]                                   # pure-JAX reference
    assert out.shape == (seq_len, batch, d_model)
    assert jnp.allclose(out, ref, atol=1e-6), "mismatch vs reference (eval path)"

    # training (dropout) path
    drop_key = jax.random.PRNGKey(42)
    p = 0.1
    out_train = positional_encoding_forward(x, pe, dropout_p=p, training=True,
                                            rng_key=drop_key)
    out_train = jax.block_until_ready(out_train)
    assert out_train.shape == (seq_len, batch, d_model)

    # kept elements must equal (x + pe) / (1 - p); dropped elements are exactly 0
    scale = 1.0 / (1.0 - p)
    kept = out_train != 0
    assert jnp.allclose(jnp.where(kept, out_train, ref * scale), ref * scale,
                        atol=1e-5), "kept values mismatch (train path)"
    keep_frac = jnp.mean(kept.astype(jnp.float32))
    assert 0.7 <= float(keep_frac) <= 1.0, "dropout rate far from expected"

    print("KERNEL_OK")
</pallas_src>

<mosaic_0001>
module attributes {stable_mosaic.version = 11 : i64} {
  func.func @_pe_add_kernel(%arg0: i32, %arg1: i32, %arg2: memref<8x64xf32, #tpu.memory_space<vmem>>, %arg3: memref<8x32xf32, #tpu.memory_space<vmem>>, %arg4: memref<8x64xf32, #tpu.memory_space<vmem>>) attributes {dimension_semantics = [#tpu.dimension_semantics<parallel>, #tpu.dimension_semantics<parallel>], iteration_bounds = array<i64: 1, 1>, scalar_prefetch = 0 : i64, scratch_operands = 0 : i64, tpu.core_type = #tpu.core_type<tc>, window_params = [{transform_indices = @transform_0, window_bounds = array<i64: 8, 64>}, {transform_indices = @transform_1, window_bounds = array<i64: 8, 32>}, {transform_indices = @transform_2, window_bounds = array<i64: 8, 64>}]} {
    %c0 = arith.constant 0 : index
    %c0_0 = arith.constant 0 : index
    %0 = vector.load %arg3[%c0, %c0_0] : memref<8x32xf32, #tpu.memory_space<vmem>>, vector<8x32xf32>
    %1 = tpu.concatenate %0, %0 in 1 : vector<8x32xf32>, vector<8x32xf32> -> vector<8x64xf32>
    %c0_1 = arith.constant 0 : index
    %c0_2 = arith.constant 0 : index
    %2 = vector.load %arg2[%c0_1, %c0_2] : memref<8x64xf32, #tpu.memory_space<vmem>>, vector<8x64xf32>
    %3 = arith.addf %2, %1 : vector<8x64xf32>
    %c0_3 = arith.constant 0 : index
    %c0_4 = arith.constant 0 : index
    %4 = vector.load %arg4[%c0_3, %c0_4] : memref<8x64xf32, #tpu.memory_space<vmem>>, vector<8x64xf32>
    tpu.vector_store %arg4[%c0_3, %c0_4], %3 {strides = array<i32>} : memref<8x64xf32, #tpu.memory_space<vmem>>, vector<8x64xf32>,
    return
  }
  func.func @transform_0(%arg0: i32, %arg1: i32) -> (i32, i32) {
    %c0_i32 = arith.constant 0 : i32
    return %arg0, %arg1 : i32, i32
  }
  func.func @transform_1(%arg0: i32, %arg1: i32) -> (i32, i32) {
    %c0_i32 = arith.constant 0 : i32
    %c0_i32_0 = arith.constant 0 : i32
    return %arg0, %c0_i32 : i32, i32
  }
  func.func @transform_2(%arg0: i32, %arg1: i32) -> (i32, i32) {
    %c0_i32 = arith.constant 0 : i32
    return %arg0, %arg1 : i32, i32
  }
}

</mosaic_0001>

<bundles_post_ra>
// kernel: tpu_custom_call.1
= control target key start
LH: loop header
LB: loop body
LE: loop exit
PB: predicated region body
PF: predicated region fallthrough
CT: control target
= control target key end

     0   :  { %7 = vsyncpa [#allocation3], 0  ;;  %s194_s0 = inlined_call_operand.hbm [shape: f32[8,64], index: 0, kind: input, shape index: {}]   ;;  %s195_s1 = inlined_call_operand.hbm [shape: f32[8,32], index: 1, kind: input, shape index: {}]   ;;  %s196_s2 = inlined_call_operand.hbm [shape: f32[8,64], index: 2, kind: output, shape index: {}]  }
   0x1   :  { %8 = vsyncpa [#allocation6], 0 }
   0x2   :  { %9 = vsyncpa [#allocation4], 0  ;;  %s139_s9 = smov [#allocation2]   ;;  %s140_s11 = smov [#allocation5]  }
   0x3   :  { %s16_s10 = sshll.u32 %s139_s9, 4  ;;  %s26_s12 = sshll.u32 %s140_s11, 4  ;;  %s17_s10 = int_to_ptr.vmem [resolvable:$true] %s16_s10  ;;  %s27_s12 = int_to_ptr.vmem [resolvable:$true] %s26_s12 }
   0x4   :  { %s67_s15 = scalar_lea.hbm %s194_s0, 128 }
   0x5   :  { %p68_p0 = scmp.ne.s32.totalorder %s194_s0, %s67_s15  ;;  %p71_p1 = scmp.lt.u32.totalorder %s67_s15, %s194_s0 }
   0x7   :  { %p73_p2 = pnand %p71_p1, %p68_p0 }
   0x9   :  { %76 = shalt.err (!%p73_p2)
}
   0xa   :  { %s77_s20 = scalar_lea.vmem %s17_s10, 128  ;;  %p82_p4 = scmp.lt.s32.totalorder %s17_s10, %s17_s10 }
   0xb   :  { %p78_p3 = scmp.ne.s32.totalorder %s17_s10, %s77_s20  ;;  %p83_p5 = scmp.lt.s32.totalorder %s77_s20, %s77_s20 }
   0xd   :  { %p84_p6 = por %p83_p5, %p82_p4 }
   0xf   :  { %p85_p7 = pnand %p84_p6, %p78_p3 }
  0x11   :  { %88 = shalt.err (!%p85_p7)
}
  0x12   :  { %19 = dma.hbm_to_vmem [thread:$0]  %s194_s0, 128, %s17_s10, [#allocation3]  }
  0x13   :  { %s89_s25 = scalar_lea.hbm %s195_s1, 128 }
  0x14   :  { %p90_p8 = scmp.ne.s32.totalorder %s195_s1, %s89_s25  ;;  %p93_p9 = scmp.lt.u32.totalorder %s89_s25, %s195_s1 }
  0x16   :  { %p95_p10 = pnand %p93_p9, %p90_p8 }
  0x18   :  { %98 = shalt.err (!%p95_p10)
}
  0x19   :  { %s99_s30 = scalar_lea.vmem %s27_s12, 128  ;;  %p104_p12 = scmp.lt.s32.totalorder %s27_s12, %s27_s12 }
  0x1a   :  { %p100_p11 = scmp.ne.s32.totalorder %s27_s12, %s99_s30  ;;  %p105_p13 = scmp.lt.s32.totalorder %s99_s30, %s99_s30 }
  0x1c   :  { %p106_p0 = por %p105_p13, %p104_p12 }
  0x1e   :  { %p107_p1 = pnand %p106_p0, %p100_p11 }
  0x20   :  { %110 = shalt.err (!%p107_p1)
}
  0x21   :  { %29 = dma.hbm_to_vmem [thread:$0]  %s195_s1, 128, %s27_s12, [#allocation6]  }
  0x22   :  { %133 = dma.done.wait [#allocation3], 128  }
  0x23   :  { %134 = vsyncadd [#allocation3], 4294967168 }
  0x24   :  { %135 = dma.done.wait [#allocation6], 128  }
  0x25   :  { %136 = vsyncadd [#allocation6], 4294967168  ;;  %v36_v0 = vld [vmem:[#allocation5] sm:$0xff]  ;;  %s141_s4 = smov 32   ;;  %vm41_vm0 = vcmask 261120   ;;  %v43_v1 = vld [vmem:[#allocation2] sm:$0xff] }
  0x26   :  { %38 = vrot.lane.b32.xlu0 %v36_v0, %s141_s4  ;;  %s142_s5 = smov [#allocation7]   ;;  %vm45_vm1 = vcmask 523264  }
  0x27   :  { %s53_s6 = sshll.u32 %s142_s5, 4  ;;  %s54_s6 = int_to_ptr.vmem [resolvable:$true] %s53_s6 }
  0x28   :  { %s111_s7 = scalar_lea.vmem %s54_s6, 128  ;;  %p116_p3 = scmp.lt.s32.totalorder %s54_s6, %s54_s6 }
  0x29   :  { %p112_p2 = scmp.ne.s32.totalorder %s54_s6, %s111_s7  ;;  %p117_p4 = scmp.lt.s32.totalorder %s111_s7, %s111_s7 }
  0x2b   :  { %p118_p5 = por %p117_p4, %p116_p3 }
  0x2d   :  { %p119_p6 = pnand %p118_p5, %p112_p2 }
  0x98   :  { %v39_v2 = vpop.permute.xlu0 %38 }
  0x99   :  { %v42_v3 = vsel %vm41_vm0, %v36_v0, %v39_v2 }
  0x9a   :  { %v44_v4 = vadd.f32 %v43_v1, %v42_v3 }
  0x9c   :  { %46 = vst.msk [vmem:[#allocation7] sm:$0xff] %vm45_vm1, %v44_v4 }
  0x9d   :  { %122 = shalt.err (!%p119_p6)
}
  0x9e   :  { %s123_s9 = scalar_lea.hbm %s196_s2, 128 }
  0x9f   :  { %p124_p7 = scmp.ne.s32.totalorder %s196_s2, %s123_s9  ;;  %p127_p8 = scmp.lt.u32.totalorder %s123_s9, %s196_s2 }
  0xa1   :  { %p129_p9 = pnand %p127_p8, %p124_p7 }
  0xa3   :  { %132 = shalt.err (!%p129_p9)
}
  0xa4   :  { %56 = dma.vmem_to_hbm [thread:$0]  %s54_s6, 128, %s196_s2, [#allocation4]  }
  0xa5   :  { %137 = dma.done.wait [#allocation4], 128  }
  0xa6   :  { %138 = vsyncadd [#allocation4], 4294967168 }
  0xa7   :  { %60 = vsyncpa [#allocation3], 1 }
  0xa8   :  { %61 = vsyncpa [#allocation6], 1 }
  0xa9   :  { %62 = vsyncpa [#allocation4], 1 }

</bundles_post_ra>
